<compile_context>
chip_gen: v5e
topology: v5e:2x2
jax: 0.10.0
libtpu: 0.0.40
codegen_flags: <defaults>
</compile_context>

<pallas_src>
import math
import functools

import jax
import jax.numpy as jnp
from jax import lax
from jax.experimental import pallas as pl
from jax.experimental.pallas import tpu as pltpu

_EPS = 1e-12  # F.normalize default eps: x / max(||x||_2, eps)


def _arcface_kernel(x_ref, inv_xn_ref, w_ref, inv_wn_ref, cos_ref, phi_ref, *,
                    cos_m, s_sin_m, s_mm, th, s, easy_margin, dot_dtype):
    # Raw (un-normalized) NT matmul on the MXU, f32 accumulation.
    raw = lax.dot_general(
        x_ref[...].astype(dot_dtype), w_ref[...].astype(dot_dtype),
        dimension_numbers=(((1,), (1,)), ((), ())),
        preferred_element_type=jnp.float32)

    # Post-scale the f32 accumulator by the hoisted inverse norms
    # (broadcast multiplies: (bb,1) over lanes, (1,bn) over sublanes).
    cos = raw * inv_xn_ref[...] * inv_wn_ref[...]

    scos = cos * s
    # Upper clamp dropped: 1 - cos^2 <= 1 always; only guard against tiny
    # negative values from rounding.
    sin = jnp.sqrt(jnp.maximum(1.0 - cos * cos, 0.0))
    sphi = scos * cos_m - sin * s_sin_m          # == s * (cos*cos_m - sin*sin_m)
    if easy_margin:
        sphi = jnp.where(cos > 0.0, sphi, scos)
    else:
        sphi = jnp.where(cos > th, sphi, scos - s_mm)

    cos_ref[...] = scos.astype(cos_ref.dtype)
    phi_ref[...] = sphi.astype(phi_ref.dtype)


def _round_up(v, m):
    return ((v + m - 1) // m) * m


def arcface_forward(x, weight, *, m=0.5, s=64.0, easy_margin=True,
                    block_n=None, block_b=None, matmul_dtype=None,
                    out_dtype=None):
    """Returns (s*cos, s*phi), each of shape (B, out_features)."""
    B, D = x.shape
    N, D2 = weight.shape
    assert D == D2

    cos_m = math.cos(m)
    sin_m = math.sin(m)
    mm = sin_m * m
    th = math.cos(math.pi - m)

    out_dtype = jnp.dtype(out_dtype) if out_dtype is not None else jnp.dtype(x.dtype)

    # Matmul operand dtype: keep native (f32 dot is multi-pass but accurate);
    # stream bf16 when either operand is bf16; allow explicit override.
    if matmul_dtype is not None:
        dot_dtype = jnp.dtype(matmul_dtype)
    elif x.dtype == jnp.bfloat16 or weight.dtype == jnp.bfloat16:
        dot_dtype = jnp.dtype(jnp.bfloat16)
    else:
        dot_dtype = jnp.result_type(x.dtype, weight.dtype)

    # Physical VMEM -> tile defaults / budget (64 MiB on v7x, 128 MiB v5e/v6e).
    try:
        info = pltpu.get_tpu_info()
        phys_vmem = int(getattr(info, "vmem_capacity_bytes", 128 << 20))
    except Exception:
        phys_vmem = 128 << 20
    vmem_cap = (phys_vmem * 3) // 4  # leave compiler scratch headroom

    # ---- tile selection --------------------------------------------------
    auto_n = block_n is None
    if auto_n:
        block_n = 1024 if phys_vmem <= (64 << 20) else 2048
    block_n = max(128, _round_up(min(block_n, _round_up(N, 128)), 128))

    auto_b = block_b is None
    if auto_b:
        block_b = 256
    block_b = max(8, _round_up(min(block_b, _round_up(B, 8)), 8))
    if auto_b:
        # Megacore: keep >= 2 batch tiles (the only sensible split) when B allows.
        while block_b > 8 and _round_up(B, block_b) // block_b < 2:
            block_b = max(8, (block_b // 2 // 8) * 8)

    xb = jnp.dtype(x.dtype).itemsize
    wb = jnp.dtype(weight.dtype).itemsize
    ob = out_dtype.itemsize

    def _vmem_estimate(bb, bn):
        return (2 * bb * D * xb                 # x tile, double-buffered
                + 2 * bn * D * wb               # weight tile, double-buffered
                + 2 * bb * 128 * 4              # inv_xn tile (lane-padded)
                + 2 * 8 * bn * 4                # inv_wn tile (sublane-padded)
                + 2 * 2 * bb * bn * ob          # two outputs, double-buffered
                + 4 * bb * bn * 4               # in-kernel f32 temporaries
                + (6 << 20))                    # headroom

    if auto_n:
        while _vmem_estimate(block_b, block_n) > vmem_cap and block_n > 128:
            block_n = max(128, (block_n // 2 // 128) * 128)
    if auto_b:
        while _vmem_estimate(block_b, block_n) > vmem_cap and block_b > 8:
            block_b = max(8, (block_b // 2 // 8) * 8)

    vmem_bytes = int(min(max(_vmem_estimate(block_b, block_n), 16 << 20), vmem_cap))

    # ---- hoisted inverse norms (cheap XLA ops, outside the kernel) --------
    xf = x.astype(jnp.float32)
    inv_xn = lax.rsqrt(jnp.maximum(
        jnp.sum(xf * xf, axis=-1, keepdims=True), _EPS * _EPS))       # (B, 1)
    wf = weight.astype(jnp.float32)
    inv_wn = lax.rsqrt(jnp.maximum(
        jnp.sum(wf * wf, axis=-1), _EPS * _EPS))[None, :]             # (1, N)

    # ---- pad B / N to tile multiples (zero rows are harmless: raw dot = 0) --
    B_pad = _round_up(B, block_b)
    N_pad = _round_up(N, block_n)
    x_p = x if B_pad == B else jnp.pad(x, ((0, B_pad - B), (0, 0)))
    inv_xn_p = inv_xn if B_pad == B else jnp.pad(inv_xn, ((0, B_pad - B), (0, 0)))
    w_p = weight if N_pad == N else jnp.pad(weight, ((0, N_pad - N), (0, 0)))
    inv_wn_p = inv_wn if N_pad == N else jnp.pad(inv_wn, ((0, 0), (0, N_pad - N)))

    grid = (B_pad // block_b, N_pad // block_n)

    kernel = functools.partial(
        _arcface_kernel, cos_m=cos_m, s_sin_m=float(s) * sin_m,
        s_mm=float(s) * mm, th=th, s=float(s),
        easy_margin=bool(easy_margin), dot_dtype=dot_dtype)

    out_shape = (jax.ShapeDtypeStruct((B_pad, N_pad), out_dtype),
                 jax.ShapeDtypeStruct((B_pad, N_pad), out_dtype))

    cos_s, phi_s = pl.pallas_call(
        kernel,
        out_shape=out_shape,
        grid_spec=pltpu.PrefetchScalarGridSpec(
            num_scalar_prefetch=0,
            grid=grid,
            in_specs=[
                pl.BlockSpec((block_b, D), lambda i, j: (i, 0)),   # x batch tile
                pl.BlockSpec((block_b, 1), lambda i, j: (i, 0)),   # inv ||x||
                pl.BlockSpec((block_n, D), lambda i, j: (j, 0)),   # weight tile
                pl.BlockSpec((1, block_n), lambda i, j: (0, j)),   # inv ||w||
            ],
            out_specs=[
                pl.BlockSpec((block_b, block_n), lambda i, j: (i, j)),
                pl.BlockSpec((block_b, block_n), lambda i, j: (i, j)),
            ],
        ),
        compiler_params=pltpu.CompilerParams(
            dimension_semantics=("parallel", "parallel"),
            vmem_limit_bytes=vmem_bytes),
    )(x_p, inv_xn_p, w_p, inv_wn_p)

    if B_pad != B or N_pad != N:
        cos_s = cos_s[:B, :N]
        phi_s = phi_s[:B, :N]
    return cos_s, phi_s


def init_arcface_weight(key, out_features, in_features):
    """Deterministic reproduction of: uniform_(-1,1).renorm_(2, 1, 1e-5).mul_(1e5)."""
    w = jax.random.uniform(key, (out_features, in_features),
                           dtype=jnp.float32, minval=-1.0, maxval=1.0)
    # renorm over dim=1: each column gets L2 norm <= 1e-5
    col_norm = jnp.sqrt(jnp.sum(w * w, axis=0, keepdims=True))
    scale = jnp.where(col_norm > 1e-5, 1e-5 / (col_norm + 1e-7), 1.0)
    w = w * scale
    return w * 1e5


def _reference(x, w, m=0.5, s=64.0, easy_margin=True):
    xn = x / jnp.maximum(jnp.linalg.norm(x, axis=-1, keepdims=True), _EPS)
    wn = w / jnp.maximum(jnp.linalg.norm(w, axis=-1, keepdims=True), _EPS)
    cos = jnp.dot(xn, wn.T, precision=jax.lax.Precision.HIGHEST)
    sin = jnp.sqrt(jnp.clip(1.0 - cos ** 2, 0.0, 1.0))
    cos_m, sin_m = math.cos(m), math.sin(m)
    phi = cos * cos_m - sin * sin_m
    if easy_margin:
        phi = jnp.where(cos > 0.0, phi, cos)
    else:
        mm = sin_m * m
        th = math.cos(math.pi - m)
        phi = jnp.where(cos > th, phi, cos - mm)
    return s * cos, s * phi


if __name__ == "__main__":
    key = jax.random.PRNGKey(0)
    k_x1, k_w1, k_x2, k_w2 = jax.random.split(key, 4)

    # Case 1: tiny shapes consistent with the module (exercises N padding).
    B1, D1, N1 = 8, 32, 16
    x1 = jax.random.normal(k_x1, (B1, D1), dtype=jnp.float32)
    w1 = init_arcface_weight(k_w1, N1, D1)
    cos1, phi1 = arcface_forward(x1, w1, m=0.5, s=64.0, easy_margin=True)

    # Case 2: small but exercises the tiled 2-D grid + hoisted inverse norms.
    B2, D2, N2 = 16, 128, 512
    x2 = jax.random.normal(k_x2, (B2, D2), dtype=jnp.float32)
    w2 = init_arcface_weight(k_w2, N2, D2)
    cos2, phi2 = arcface_forward(x2, w2, m=0.5, s=64.0, easy_margin=True,
                                 block_n=256, block_b=8)

    # Case 3: non-easy-margin path.
    cos3, phi3 = arcface_forward(x2, w2, m=0.5, s=64.0, easy_margin=False,
                                 block_n=256, block_b=8)

    jax.block_until_ready((cos1, phi1, cos2, phi2, cos3, phi3))

    cr1, pr1 = _reference(x1, w1, easy_margin=True)
    cr2, pr2 = _reference(x2, w2, easy_margin=True)
    cr3, pr3 = _reference(x2, w2, easy_margin=False)
    assert jnp.allclose(cos1, cr1, atol=2e-3, rtol=2e-3)
    assert jnp.allclose(phi1, pr1, atol=2e-3, rtol=2e-3)
    assert jnp.allclose(cos2, cr2, atol=2e-3, rtol=2e-3)
    assert jnp.allclose(phi2, pr2, atol=2e-3, rtol=2e-3)
    assert jnp.allclose(cos3, cr3, atol=2e-3, rtol=2e-3)
    assert jnp.allclose(phi3, pr3, atol=2e-3, rtol=2e-3)

    print("KERNEL_OK")
</pallas_src>

<mosaic_0001>
module attributes {stable_mosaic.version = 11 : i64} {
  func.func @_arcface_kernel(%arg0: i32, %arg1: i32, %arg2: memref<8x32xf32, #tpu.memory_space<vmem>>, %arg3: memref<8x1xf32, #tpu.memory_space<vmem>>, %arg4: memref<128x32xf32, #tpu.memory_space<vmem>>, %arg5: memref<1x128xf32, #tpu.memory_space<vmem>>, %arg6: memref<8x128xf32, #tpu.memory_space<vmem>>, %arg7: memref<8x128xf32, #tpu.memory_space<vmem>>) attributes {dimension_semantics = [#tpu.dimension_semantics<parallel>, #tpu.dimension_semantics<parallel>], iteration_bounds = array<i64: 1, 1>, scalar_prefetch = 0 : i64, scratch_operands = 0 : i64, tpu.core_type = #tpu.core_type<tc>, window_params = [{transform_indices = @transform_0, window_bounds = array<i64: 8, 32>}, {transform_indices = @transform_1, window_bounds = array<i64: 8, 1>}, {transform_indices = @transform_2, window_bounds = array<i64: 128, 32>}, {transform_indices = @transform_3, window_bounds = array<i64: 1, 128>}, {transform_indices = @transform_4, window_bounds = array<i64: 8, 128>}, {transform_indices = @transform_5, window_bounds = array<i64: 8, 128>}]} {
    %c0 = arith.constant 0 : index
    %c0_0 = arith.constant 0 : index
    %0 = vector.load %arg2[%c0, %c0_0] : memref<8x32xf32, #tpu.memory_space<vmem>>, vector<8x32xf32>
    %c0_1 = arith.constant 0 : index
    %c0_2 = arith.constant 0 : index
    %1 = vector.load %arg4[%c0_1, %c0_2] : memref<128x32xf32, #tpu.memory_space<vmem>>, vector<128x32xf32>
    %cst = arith.constant dense<0.000000e+00> : vector<8x128xf32>
    %2 = tpu.matmul %0, %1, %cst {dimension_numbers = #tpu.dot_dimension_numbers<[1], [1], [0], [0], [0, 0, 1, 0], [], []>} : vector<8x32xf32>, vector<128x32xf32>, vector<8x128xf32> -> vector<8x128xf32>
    %c0_3 = arith.constant 0 : index
    %c0_4 = arith.constant 0 : index
    %3 = vector.load %arg3[%c0_3, %c0_4] : memref<8x1xf32, #tpu.memory_space<vmem>>, vector<8x1xf32>
    %4 = vector.broadcast %3 : vector<8x1xf32> to vector<8x128xf32>
    %5 = arith.mulf %2, %4 : vector<8x128xf32>
    %c0_5 = arith.constant 0 : index
    %c0_6 = arith.constant 0 : index
    %6 = vector.load %arg5[%c0_5, %c0_6] : memref<1x128xf32, #tpu.memory_space<vmem>>, vector<1x128xf32>
    %7 = vector.broadcast %6 : vector<1x128xf32> to vector<8x128xf32>
    %8 = arith.mulf %5, %7 : vector<8x128xf32>
    %cst_7 = arith.constant 6.400000e+01 : f32
    %9 = vector.broadcast %cst_7 : f32 to vector<8x128xf32>
    %10 = arith.mulf %8, %9 : vector<8x128xf32>
    %11 = arith.mulf %8, %8 : vector<8x128xf32>
    %cst_8 = arith.constant 1.000000e+00 : f32
    %12 = vector.broadcast %cst_8 : f32 to vector<8x128xf32>
    %13 = arith.subf %12, %11 : vector<8x128xf32>
    %cst_9 = arith.constant 0.000000e+00 : f32
    %14 = vector.broadcast %cst_9 : f32 to vector<8x128xf32>
    %15 = arith.maximumf %13, %14 : vector<8x128xf32>
    %16 = math.sqrt %15 : vector<8x128xf32>
    %cst_10 = arith.constant 0.87758255 : f32
    %17 = vector.broadcast %cst_10 : f32 to vector<8x128xf32>
    %18 = arith.mulf %10, %17 : vector<8x128xf32>
    %cst_11 = arith.constant 30.6832352 : f32
    %19 = vector.broadcast %cst_11 : f32 to vector<8x128xf32>
    %20 = arith.mulf %16, %19 : vector<8x128xf32>
    %21 = arith.subf %18, %20 : vector<8x128xf32>
    %cst_12 = arith.constant 0.000000e+00 : f32
    %22 = vector.broadcast %cst_12 : f32 to vector<8x128xf32>
    %23 = arith.cmpf ogt, %8, %22 : vector<8x128xf32>
    %24 = arith.select %23, %21, %10 : vector<8x128xi1>, vector<8x128xf32>
    %c0_13 = arith.constant 0 : index
    %c0_14 = arith.constant 0 : index
    %25 = vector.load %arg6[%c0_13, %c0_14] : memref<8x128xf32, #tpu.memory_space<vmem>>, vector<8x128xf32>
    tpu.vector_store %arg6[%c0_13, %c0_14], %10 {strides = array<i32>} : memref<8x128xf32, #tpu.memory_space<vmem>>, vector<8x128xf32>,
    %c0_15 = arith.constant 0 : index
    %c0_16 = arith.constant 0 : index
    %26 = vector.load %arg7[%c0_15, %c0_16] : memref<8x128xf32, #tpu.memory_space<vmem>>, vector<8x128xf32>
    tpu.vector_store %arg7[%c0_15, %c0_16], %24 {strides = array<i32>} : memref<8x128xf32, #tpu.memory_space<vmem>>, vector<8x128xf32>,
    return
  }
  func.func @transform_0(%arg0: i32, %arg1: i32) -> (i32, i32) {
    %c0_i32 = arith.constant 0 : i32
    %c0_i32_0 = arith.constant 0 : i32
    return %arg0, %c0_i32 : i32, i32
  }
  func.func @transform_1(%arg0: i32, %arg1: i32) -> (i32, i32) {
    %c0_i32 = arith.constant 0 : i32
    %c0_i32_0 = arith.constant 0 : i32
    return %arg0, %c0_i32 : i32, i32
  }
  func.func @transform_2(%arg0: i32, %arg1: i32) -> (i32, i32) {
    %c0_i32 = arith.constant 0 : i32
    %c0_i32_0 = arith.constant 0 : i32
    return %arg1, %c0_i32 : i32, i32
  }
  func.func @transform_3(%arg0: i32, %arg1: i32) -> (i32, i32) {
    %c0_i32 = arith.constant 0 : i32
    %c0_i32_0 = arith.constant 0 : i32
    return %c0_i32, %arg1 : i32, i32
  }
  func.func @transform_4(%arg0: i32, %arg1: i32) -> (i32, i32) {
    %c0_i32 = arith.constant 0 : i32
    return %arg0, %arg1 : i32, i32
  }
  func.func @transform_5(%arg0: i32, %arg1: i32) -> (i32, i32) {
    %c0_i32 = arith.constant 0 : i32
    return %arg0, %arg1 : i32, i32
  }
}

</mosaic_0001>

<bundles_post_ra>
// kernel: tpu_custom_call.1
= control target key start
LH: loop header
LB: loop body
LE: loop exit
PB: predicated region body
PF: predicated region fallthrough
CT: control target
= control target key end

     0   :  { %11 = vsyncpa [#allocation3], 0  ;;  %vm38_vm0 = vcmask 261120   ;;  %s366_s0 = inlined_call_operand.vmem [shape: f32[8,32], index: 0, kind: input, shape index: {}]   ;;  %s367_s1 = inlined_call_operand.vmem [shape: f32[8,1], index: 1, kind: input, shape index: {}]   ;;  %s368_s2 = inlined_call_operand.vmem [shape: f32[128,32], index: 2, kind: input, shape index: {}]   ;;  %s369_s3 = inlined_call_operand.vmem [shape: f32[1,128], index: 3, kind: input, shape index: {}]   ;;  %s370_s4 = inlined_call_operand.hbm [shape: f32[8,128], index: 4, kind: output, shape index: {0}]   ;;  %s371_s5 = inlined_call_operand.hbm [shape: f32[8,128], index: 5, kind: output, shape index: {1}]  }
   0x1   :  { %v37_v0 = vld [vmem:[%s368_s2 + $0x78] sm:$0xff]  ;;  %v36_v1 = vld [vmem:[%s368_s2 + $0x70] sm:$0xff] }
   0x2   :  { %177 = vmatpush.xpose.msk.msra.mxu0 %vm38_vm0, %v37_v0 }
   0x3   :  { %12 = vsyncpa [#allocation5], 0  ;;  %v35_v2 = vld [vmem:[%s368_s2 + $0x68] sm:$0xff]  ;;  %v34_v3 = vld [vmem:[%s368_s2 + $0x60] sm:$0xff]  ;;  %v253_v10 = vmov 0   ;;  %s254_s30 = smov [#allocation2]  }
   0x4   :  { %v33_v4 = vld [vmem:[%s368_s2 + $0x58] sm:$0xff]  ;;  %v32_v5 = vld [vmem:[%s368_s2 + $0x50] sm:$0xff]  ;;  %v31_v6 = vld [vmem:[%s368_s2 + $0x48] sm:$0xff]  ;;  %197 = vset.pattern.permute.xlu0 %v253_v10  ;;  %s150_s6 = sshll.u32 %s254_s30, 4  ;;  %s163_s10 = sshll.u32 %s371_s5, 4  ;;  %s151_s6 = int_to_ptr.vmem [resolvable:$true] %s150_s6  ;;  %s164_s10 = int_to_ptr.hbm [resolvable:$true] %s163_s10 }
   0x5   :  { %v30_v7 = vld [vmem:[%s368_s2 + $0x40] sm:$0xff]  ;;  %v29_v8 = vld [vmem:[%s368_s2 + $0x38] sm:$0xff]  ;;  %v28_v11 = vld [vmem:[%s368_s2 + $0x30] sm:$0xff] }
   0x6   :  { %178 = vmatpush.xpose.msk.msra.mxu0 %vm38_vm0, %v36_v1  ;;  %v110_v9 = vld [vmem:[%s367_s1] sm:$0xff]  ;;  %v27_v12 = vld [vmem:[%s368_s2 + $0x28] sm:$0xff]  ;;  %v25_v14 = vld [vmem:[%s368_s2 + $0x18] sm:$0xff] }
   0x7   :  { %113 = vperm.xlu0 %197, %v110_v9   ;;  %v26_v13 = vld [vmem:[%s368_s2 + $0x20] sm:$0xff]  ;;  %v24_v15 = vld [vmem:[%s368_s2 + $0x10] sm:$0xff]  ;;  %v23_v16 = vld [vmem:[%s368_s2 + $0x8] sm:$0xff] }
   0x8   :  { %v22_v17 = vld [vmem:[%s368_s2] sm:$0xff]  ;;  %s152_s2 = sshll.u32 %s370_s4, 4  ;;  %s153_s2 = int_to_ptr.hbm [resolvable:$true] %s152_s2 }
   0x9   :  { %v21_v18 = vld [vmem:[%s366_s0] sm:$0xff]  ;;  %s255_s0 = smov [#allocation4]  }
   0xa   :  { %179 = vmatpush.xpose.msk.msra.mxu0 %vm38_vm0, %v35_v2  ;;  %v198_v20 = vld [vmem:[%s369_s3] ss:$0 sm:$0xff]  ;;  %s161_s3 = sshll.u32 %s255_s0, 4  ;;  %s162_s3 = int_to_ptr.vmem [resolvable:$true] %s161_s3 }
   0xe   :  { %180 = vmatpush.xpose.msk.msra.mxu0 %vm38_vm0, %v34_v3 }
  0x12   :  { %181 = vmatpush.xpose.msk.msra.mxu0 %vm38_vm0, %v33_v4 }
  0x16   :  { %182 = vmatpush.xpose.msk.msra.mxu0 %vm38_vm0, %v32_v5 }
  0x1a   :  { %183 = vmatpush.xpose.msk.msra.mxu0 %vm38_vm0, %v31_v6 }
  0x1e   :  { %184 = vmatpush.xpose.msk.msra.mxu0 %vm38_vm0, %v30_v7 }
  0x22   :  { %185 = vmatpush.xpose.msk.msra.mxu0 %vm38_vm0, %v29_v8 }
  0x26   :  { %186 = vmatpush.xpose.msk.msra.mxu0 %vm38_vm0, %v28_v11 }
  0x2a   :  { %187 = vmatpush.xpose.msk.msra.mxu0 %vm38_vm0, %v27_v12 }
  0x2e   :  { %188 = vmatpush.xpose.msk.msra.mxu0 %vm38_vm0, %v26_v13 }
  0x32   :  { %189 = vmatpush.xpose.msk.msra.mxu0 %vm38_vm0, %v25_v14 }
  0x36   :  { %190 = vmatpush.xpose.msk.msra.mxu0 %vm38_vm0, %v24_v15 }
  0x3a   :  { %191 = vmatpush.xpose.msk.msra.mxu0 %vm38_vm0, %v23_v16 }
  0x3e   :  { %192 = vmatpush.xpose.msk.msra.mxu0 %vm38_vm0, %v22_v17 }
  0x41   :  { %193 = vmatmul.msk.f32.vlgmr.msra.gmra.mxu0 %vm38_vm0, %v21_v18 }
  0x79   :  { %v114_v19 = vpop.permute.xlu0 %113 }
  0xbe   :  { %v107_v21 = vpop.f32.mrf.mxu0 }
  0xbf   :  { %v116_v22 = vmul.f32 %v114_v19, %v107_v21 }
  0xc1   :  { %v121_v23 = vmul.f32 %v198_v20, %v116_v22 }
  0xc3   :  { %v123_v24 = vmul.f32 %v121_v23, %v121_v23  ;;  %v122_v25 = vmul.f32 64.0, %v121_v23  ;;  %vm141_vm3 = vcmp.gt.f32.partialorder %v121_v23, 0.0 }
  0xc5   :  { %v124_v26 = vsub.f32 1.0, %v123_v24  ;;  %143 = vst [vmem:[#allocation2] sm:$0xff] %v122_v25  ;;  %v138_v38 = vmul.f32 0.87758255, %v122_v25 }
  0xc6   :  { %155 = dma.vmem_to_hbm [thread:$0]  %s151_s6, 128, %s153_s2, [#allocation3]  }
  0xc7   :  { %v125_v27 = vmax.f32 %v124_v26, 0.0 }
  0xc9   :  { %199 = vrsqrt.f32 %v125_v27  ;;  %vm133_vm1 = vcmp.eq.f32.partialorder %v125_v27, inf  ;;  %v136_v35 = vand.u32 2147483648, %v125_v27  ;;  %vm135_vm2 = vcmp.eq.f32.partialorder %v125_v27, 0.0 }
  0xcf   :  { %v200_v28 = vpop.eup %199 }
  0xd0   :  { %v127_v29 = vmul.f32 %v200_v28, %v125_v27 }
  0xd2   :  { %v128_v30 = vmul.f32 %v200_v28, %v127_v29 }
  0xd4   :  { %v129_v31 = vmul.f32 0.5, %v128_v30 }
  0xd6   :  { %v130_v32 = vsub.f32 1.5, %v129_v31 }
  0xd8   :  { %v131_v33 = vmul.f32 %v200_v28, %v130_v32 }
  0xda   :  { %v132_v34 = vmul.f32 %v131_v33, %v125_v27 }
  0xdc   :  { %v134_v36 = vsel %vm133_vm1, %v125_v27, %v132_v34 }
  0xdd   :  { %v137_v37 = vsel %vm135_vm2, %v136_v35, %v134_v36 }
  0xde   :  { %v139_v39 = vmul.f32 30.683235, %v137_v37 }
  0xe0   :  { %v140_v40 = vsub.f32 %v138_v38, %v139_v39 }
  0xe2   :  { %v142_v41 = vsel %vm141_vm3, %v140_v40, %v122_v25 }
  0xe3   :  { %144 = vst [vmem:[#allocation4] sm:$0xff] %v142_v41 }
  0xe4   :  { %166 = dma.vmem_to_hbm [thread:$0]  %s162_s3, 128, %s164_s10, [#allocation5]  }
  0xe5   :  { %249 = dma.done.wait [#allocation3], 128  }
  0xe6   :  { %250 = vsyncadd [#allocation3], 4294967168 }
  0xe7   :  { %251 = dma.done.wait [#allocation5], 128  }
  0xe8   :  { %252 = vsyncadd [#allocation5], 4294967168 }
  0xe9   :  { %175 = vsyncpa [#allocation3], 1 }
  0xea   :  { %176 = vsyncpa [#allocation5], 1 }

</bundles_post_ra>
